<compile_context>
chip_gen: v6e
topology: v6e:2x2x1
jax: 0.10.0
libtpu: 0.0.40
codegen_flags: <defaults>
</compile_context>

<pallas_src>
import functools

import jax
import jax.numpy as jnp
from jax.experimental import pallas as pl
from jax.experimental.pallas import tpu as pltpu


def _round_up(a: int, b: int) -> int:
    return ((a + b - 1) // b) * b


def _select_tile(batch: int, num_classes: int, itemsize: int):
    """Pick the batch-tile (rows per grid step) and the padded batch size."""
    # Budget for the two double-buffered input tiles: 2 inputs x 2 buffers.
    budget_bytes = 16 * 1024 * 1024
    cap = budget_bytes // (4 * num_classes * itemsize)
    cap = max(int(cap), 8)
    cap = min(cap, 1024)                 # diminishing returns past ~1K rows
    sub = 16 if itemsize < 4 else 8      # sublane multiple (packed dtypes)
    if batch <= cap:
        tb = _round_up(batch, sub)       # one tile covers the whole batch
    else:
        tb = max((cap // sub) * sub, sub)
    batch_pad = _round_up(batch, tb)
    return tb, batch_pad


def _stce_kernel(x_ref, y_ref, loss_ref):
    """One grid step handles a (tb, C) tile of rows; pure VPU/EUP/XLU work."""
    x = x_ref[...].astype(jnp.float32)            # (tb, C)
    y = y_ref[...].astype(jnp.float32)            # (tb, C)

    # Fused soft-target CE:
    #   sum(-y * log_softmax(x)) = sum(y) * logsumexp(x) - sum(y * x)
    m = jnp.max(x, axis=-1, keepdims=True)                              # (tb, 1)
    lse = m + jnp.log(jnp.sum(jnp.exp(x - m), axis=-1, keepdims=True))  # (tb, 1)
    sy = jnp.sum(y, axis=-1, keepdims=True)                             # (tb, 1)
    syx = jnp.sum(y * x, axis=-1, keepdims=True)                        # (tb, 1)

    loss_ref[...] = (sy * lse - syx).astype(loss_ref.dtype)             # (tb, 1)


@functools.partial(jax.jit, static_argnames=("reduction",))
def soft_target_cross_entropy(x, y, reduction: str = "mean"):
    """Pallas implementation of SoftTargetCrossEntropy.forward.

    x, y: arrays of shape [B, C] (batch, num_classes); softmax over dim=-1.
    """
    B, C = x.shape
    assert y.shape == (B, C)

    itemsize = jnp.dtype(x.dtype).itemsize
    tb, B_pad = _select_tile(B, C, itemsize)

    if B_pad != B:
        pad = ((0, B_pad - B), (0, 0))
        x = jnp.pad(x, pad)   # padded rows: y == 0  =>  loss == 0
        y = jnp.pad(y, pad)

    loss_rows = pl.pallas_call(
        _stce_kernel,
        out_shape=jax.ShapeDtypeStruct((B_pad, 1), jnp.float32),
        grid_spec=pl.GridSpec(
            grid=(B_pad // tb,),
            in_specs=[
                pl.BlockSpec((tb, C), lambda i: (i, 0)),
                pl.BlockSpec((tb, C), lambda i: (i, 0)),
            ],
            out_specs=pl.BlockSpec((tb, 1), lambda i: (i, 0)),
        ),
        compiler_params=pltpu.CompilerParams(
            dimension_semantics=("parallel",),      # batch axis is independent
            vmem_limit_bytes=48 * 1024 * 1024,      # headroom under v7x 64 MiB
        ),
    )(x, y)

    loss = loss_rows[:B, 0]
    if reduction == "mean":
        return loss.mean()
    elif reduction == "none":
        return loss
    else:
        raise NotImplementedError


if __name__ == "__main__":
    key = jax.random.PRNGKey(0)
    kx, ky = jax.random.split(key)

    # Case 1: small, tile-aligned batch.
    B, C = 8, 128
    x = jax.random.normal(kx, (B, C), dtype=jnp.float32)
    y = jax.nn.softmax(jax.random.normal(ky, (B, C), dtype=jnp.float32), axis=-1)

    ref_rows = jnp.sum(-y * jax.nn.log_softmax(x, axis=-1), axis=-1)

    loss_mean = jax.block_until_ready(soft_target_cross_entropy(x, y, reduction="mean"))
    loss_none = jax.block_until_ready(soft_target_cross_entropy(x, y, reduction="none"))
    assert loss_none.shape == (B,)
    assert loss_mean.shape == ()
    assert jnp.allclose(loss_none, ref_rows, atol=1e-5, rtol=1e-5)
    assert jnp.allclose(loss_mean, ref_rows.mean(), atol=1e-5, rtol=1e-5)

    # Case 2: batch needing padding, odd class count.
    B2, C2 = 20, 257
    x2 = jax.random.normal(kx, (B2, C2), dtype=jnp.float32)
    y2 = jax.nn.softmax(jax.random.normal(ky, (B2, C2), dtype=jnp.float32), axis=-1)
    ref2 = jnp.sum(-y2 * jax.nn.log_softmax(x2, axis=-1), axis=-1)
    out2 = jax.block_until_ready(soft_target_cross_entropy(x2, y2, reduction="none"))
    assert out2.shape == (B2,)
    assert jnp.allclose(out2, ref2, atol=1e-5, rtol=1e-5)

    # Case 3: bf16 inputs passed straight through (upcast happens in-kernel).
    xb = x2.astype(jnp.bfloat16)
    yb = y2.astype(jnp.bfloat16)
    refb = jnp.sum(
        -yb.astype(jnp.float32) * jax.nn.log_softmax(xb.astype(jnp.float32), axis=-1),
        axis=-1,
    )
    outb = jax.block_until_ready(soft_target_cross_entropy(xb, yb, reduction="none"))
    assert jnp.allclose(outb, refb, atol=1e-4, rtol=1e-4)

    print("KERNEL_OK")
</pallas_src>

<mosaic_0001>
module attributes {stable_mosaic.version = 11 : i64} {
  func.func @_stce_kernel(%arg0: i32, %arg1: memref<8x128xf32, #tpu.memory_space<vmem>>, %arg2: memref<8x128xf32, #tpu.memory_space<vmem>>, %arg3: memref<8x1xf32, #tpu.memory_space<vmem>>) attributes {dimension_semantics = [#tpu.dimension_semantics<parallel>], iteration_bounds = array<i64: 1>, scalar_prefetch = 0 : i64, scratch_operands = 0 : i64, tpu.core_type = #tpu.core_type<tc>, window_params = [{transform_indices = @transform_0, window_bounds = array<i64: 8, 128>}, {transform_indices = @transform_1, window_bounds = array<i64: 8, 128>}, {transform_indices = @transform_2, window_bounds = array<i64: 8, 1>}]} {
    %c0 = arith.constant 0 : index
    %c0_0 = arith.constant 0 : index
    %0 = vector.load %arg1[%c0, %c0_0] : memref<8x128xf32, #tpu.memory_space<vmem>>, vector<8x128xf32>
    %c0_1 = arith.constant 0 : index
    %c0_2 = arith.constant 0 : index
    %1 = vector.load %arg2[%c0_1, %c0_2] : memref<8x128xf32, #tpu.memory_space<vmem>>, vector<8x128xf32>
    %cst = arith.constant dense<0xFF800000> : vector<8xf32>
    %2 = vector.multi_reduction <maximumf>, %0, %cst [1] : vector<8x128xf32> to vector<8xf32>
    %3 = vector.shape_cast %2 : vector<8xf32> to vector<8x1xf32>
    %4 = vector.broadcast %3 : vector<8x1xf32> to vector<8x128xf32>
    %5 = arith.subf %0, %4 : vector<8x128xf32>
    %6 = math.exp %5 : vector<8x128xf32>
    %cst_3 = arith.constant dense<0.000000e+00> : vector<8xf32>
    %7 = vector.multi_reduction <add>, %6, %cst_3 [1] : vector<8x128xf32> to vector<8xf32>
    %8 = vector.shape_cast %7 : vector<8xf32> to vector<8x1xf32>
    %9 = math.log %8 : vector<8x1xf32>
    %10 = arith.addf %3, %9 : vector<8x1xf32>
    %cst_4 = arith.constant dense<0.000000e+00> : vector<8xf32>
    %11 = vector.multi_reduction <add>, %1, %cst_4 [1] : vector<8x128xf32> to vector<8xf32>
    %12 = vector.shape_cast %11 : vector<8xf32> to vector<8x1xf32>
    %13 = arith.mulf %1, %0 : vector<8x128xf32>
    %cst_5 = arith.constant dense<0.000000e+00> : vector<8xf32>
    %14 = vector.multi_reduction <add>, %13, %cst_5 [1] : vector<8x128xf32> to vector<8xf32>
    %15 = vector.shape_cast %14 : vector<8xf32> to vector<8x1xf32>
    %16 = arith.mulf %12, %10 : vector<8x1xf32>
    %17 = arith.subf %16, %15 : vector<8x1xf32>
    %c0_6 = arith.constant 0 : index
    %c0_7 = arith.constant 0 : index
    %18 = vector.load %arg3[%c0_6, %c0_7] : memref<8x1xf32, #tpu.memory_space<vmem>>, vector<8x1xf32>
    tpu.vector_store %arg3[%c0_6, %c0_7], %17 {strides = array<i32>} : memref<8x1xf32, #tpu.memory_space<vmem>>, vector<8x1xf32>,
    return
  }
  func.func @transform_0(%arg0: i32) -> (i32, i32) {
    %c0_i32 = arith.constant 0 : i32
    %c0_i32_0 = arith.constant 0 : i32
    return %arg0, %c0_i32 : i32, i32
  }
  func.func @transform_1(%arg0: i32) -> (i32, i32) {
    %c0_i32 = arith.constant 0 : i32
    %c0_i32_0 = arith.constant 0 : i32
    return %arg0, %c0_i32 : i32, i32
  }
  func.func @transform_2(%arg0: i32) -> (i32, i32) {
    %c0_i32 = arith.constant 0 : i32
    %c0_i32_0 = arith.constant 0 : i32
    return %arg0, %c0_i32 : i32, i32
  }
}

</mosaic_0001>

<bundles_post_ra>
// kernel: soft_target_cross_entropy.1
= control target key start
LH: loop header
LB: loop body
LE: loop exit
PB: predicated region body
PF: predicated region fallthrough
CT: control target
= control target key end

     0   :  { %7 = vsyncpa [#allocation3], 0  ;;  %s138_s0 = inlined_call_operand.hbm [shape: f32[8,128], index: 0, kind: input, shape index: {}]   ;;  %s139_s1 = inlined_call_operand.hbm [shape: f32[8,128], index: 1, kind: input, shape index: {}]   ;;  %s140_s2 = inlined_call_operand.vmem [shape: f32[8,1], index: 2, kind: output, shape index: {}]  }
   0x1   :  { %8 = vsyncpa [#allocation5], 0  ;;  %s112_s9 = smov [#allocation2]   ;;  %s113_s11 = smov [#allocation4]  }
   0x2   :  { %s15_s10 = sshll.u32 %s112_s9, 4  ;;  %s25_s12 = sshll.u32 %s113_s11, 4  ;;  %s16_s10 = int_to_ptr.vmem [resolvable:$true] %s15_s10  ;;  %s26_s12 = int_to_ptr.vmem [resolvable:$true] %s25_s12 }
   0x3   :  { %s76_s13 = scalar_lea.vmem %s16_s10, 128  ;;  %p81_p1 = scmp.lt.s32.totalorder %s16_s10, %s16_s10 }
   0x4   :  { %p77_p0 = scmp.ne.s32.totalorder %s16_s10, %s76_s13  ;;  %p82_p2 = scmp.lt.s32.totalorder %s76_s13, %s76_s13 }
   0x6   :  { %p83_p3 = por %p82_p2, %p81_p1 }
   0x8   :  { %p84_p4 = pnand %p83_p3, %p77_p0 }
   0xa   :  { %87 = shalt.err (!%p84_p4)
}
   0xb   :  { %18 = dma.hbm_to_vmem [thread:$0]  %s138_s0, 128, %s16_s10, [#allocation3]  }
   0xc   :  { %s96_s16 = scalar_lea.vmem %s26_s12, 128  ;;  %p101_p6 = scmp.lt.s32.totalorder %s26_s12, %s26_s12 }
   0xd   :  { %p97_p5 = scmp.ne.s32.totalorder %s26_s12, %s96_s16  ;;  %p102_p7 = scmp.lt.s32.totalorder %s96_s16, %s96_s16 }
   0xf   :  { %p103_p8 = por %p102_p7, %p101_p6 }
  0x11   :  { %p104_p9 = pnand %p103_p8, %p97_p5 }
  0x13   :  { %107 = shalt.err (!%p104_p9)
}
  0x14   :  { %28 = dma.hbm_to_vmem [thread:$0]  %s139_s1, 128, %s26_s12, [#allocation5]  }
  0x15   :  { %108 = dma.done.wait [#allocation3], 128  }
  0x16   :  { %109 = vsyncadd [#allocation3], 4294967168 }
  0x17   :  { %110 = dma.done.wait [#allocation5], 128  }
  0x18   :  { %111 = vsyncadd [#allocation5], 4294967168  ;;  %v35_v0 = vld [vmem:[#allocation2] sm:$0xff]  ;;  %v36_v1 = vld [vmem:[#allocation4] sm:$0xff]  ;;  %vm54_vm0 = vcmask 7168  }
  0x19   :  { %37 = vmax.xlane.f32.xlu0 %v35_v0  ;;  %47 = vadd.xlane.f32.xlu1 %v36_v1  ;;  %v49_v2 = vmul.f32 %v36_v1, %v35_v0 }
  0x1d   :  { %50 = vadd.xlane.f32.xlu1 %v49_v2 }
  0xa2   :  { %v38_v3 = vpop.xlane.xlu0 %37  ;;  %v48_v8 = vpop.xlane.xlu1 %47 }
  0xa3   :  { %v39_v4 = vsub.f32 %v35_v0, %v38_v3 }
  0xa5   :  { %v40_v5 = vmul.f32 1.442695, %v39_v4 }
  0xa6   :  { %v51_v12 = vpop.xlane.xlu1 %50 }
  0xa7   :  { %64 = vpow2.f32 %v40_v5 }
  0xb4   :  { %v65_v6 = vpop.eup %64 }
  0xb5   :  { %42 = vadd.xlane.f32.xlu0 %v65_v6 }
 0x13e   :  { %v43_v7 = vpop.xlane.xlu0 %42 }
 0x13f   :  { %66 = vlog2.f32 %v43_v7 }
 0x14c   :  { %v67_v9 = vpop.eup %66 }
 0x14d   :  { %v45_v10 = vmul.f32 0.6931472, %v67_v9 }
 0x14f   :  { %v46_v11 = vadd.f32 %v45_v10, %v38_v3 }
 0x151   :  { %v52_v13 = vmul.f32 %v48_v8, %v46_v11 }
 0x153   :  { %v53_v14 = vsub.f32 %v52_v13, %v51_v12 }
 0x155   :  { %55 = vst.msk [vmem:[%s140_s2] sm:$0xff] %vm54_vm0, %v53_v14 }
 0x156   :  { %60 = vsyncpa [#allocation3], 1 }
 0x157   :  { %61 = vsyncpa [#allocation5], 1 }

</bundles_post_ra>
